<compile_context>
chip_gen: v7x
topology: tpu7x:2x2x1
jax: 0.10.0
libtpu: 0.0.40
codegen_flags: <defaults>
</compile_context>

<pallas_src>
import functools

import jax
import jax.numpy as jnp
from jax.experimental import pallas as pl
from jax.experimental.pallas import tpu as pltpu

BN_EPS = 1e-5
_TILE_BUDGET_BYTES = 4 << 20   # per-tile x budget (double-buffered by Pallas)


def _stats_kernel(x_ref, wt_ref, stats_ref):
    """Pass 1: per-channel sum and sum-of-squares of the (bias-free) 1x1 conv."""
    @pl.when(jnp.logical_and(pl.program_id(0) == 0, pl.program_id(1) == 0))
    def _init():
        stats_ref[...] = jnp.zeros_like(stats_ref)

    # (Cout, Cin) @ (Cin, TH) -> (Cout, TH), f32 accumulation on the MXU.
    t = jnp.dot(wt_ref[...], x_ref[0], preferred_element_type=jnp.float32)
    stats_ref[:, 0:1] += jnp.sum(t, axis=1, keepdims=True)        # sum
    stats_ref[:, 1:2] += jnp.sum(t * t, axis=1, keepdims=True)    # sum of squares


def _norm_pool_kernel(x_ref, ws_ref, shift_ref, o_ref, *, inv_hw):
    """Pass 2: (scale-folded) conv tile -> +shift -> ReLU -> accumulate spatial mean."""
    h = pl.program_id(1)

    @pl.when(h == 0)
    def _init():
        o_ref[...] = jnp.zeros_like(o_ref)

    # scale is pre-folded into ws, so this is the full BN affine already.
    t = jnp.dot(ws_ref[...], x_ref[0], preferred_element_type=jnp.float32)  # (Cout, TH)
    y = jnp.maximum(t + shift_ref[...], 0.0)
    o_ref[...] += jnp.sum(y, axis=1, keepdims=True)[None, :, :]             # (1, Cout, 1)

    @pl.when(h == pl.num_programs(1) - 1)
    def _finalize():
        o_ref[...] = o_ref[...] * inv_hw


def _pick_block_hw(hw, cin):
    """Largest multiple-of-128 divisor of HW within the VMEM tile budget."""
    if hw * cin * 4 <= _TILE_BUDGET_BYTES:
        return hw                                   # whole spatial extent fits: one tile
    cap = max(128, (_TILE_BUDGET_BYTES // (cin * 4)) // 128 * 128)
    b = cap
    while b >= 128:
        if hw % b == 0:
            return b
        b -= 128
    return hw                                       # no aligned divisor: full extent


def global_block(x, params, *, block_hw=None):
    """x: (N, Cin, H, W) -> (N, Cout, 1, 1). Training-mode BN (batch statistics)."""
    N, Cin, H, W = x.shape
    Cout = params["w"].shape[0]
    HW = H * W

    # NCHW -> (N, Cin, HW): contiguous reshape, no HBM transpose.
    xr = x.reshape(N, Cin, HW).astype(jnp.float32)

    if block_hw is None:
        block_hw = _pick_block_hw(HW, Cin)
    assert HW % block_hw == 0, "block_hw must divide H*W"
    n_hw = HW // block_hw

    tile_bytes = Cin * block_hw * 4
    vmem_limit = None
    if tile_bytes > _TILE_BUDGET_BYTES:             # only for the full-extent fallback
        vmem_limit = min(2 * tile_bytes + (4 << 20), 64 << 20)

    wt = params["w"].astype(jnp.float32)            # (Cout, Cin) — PyTorch layout
    gamma = params["gamma"].astype(jnp.float32)
    beta = params["beta"].astype(jnp.float32)

    x_spec = pl.BlockSpec((1, Cin, block_hw), lambda n, h: (n, 0, h))
    w_spec = pl.BlockSpec((Cout, Cin), lambda n, h: (0, 0))

    # ---- Pass 1: batch statistics over (N, H, W) ----------------------------
    stats = pl.pallas_call(
        _stats_kernel,
        out_shape=jax.ShapeDtypeStruct((Cout, 2), jnp.float32),
        grid=(N, n_hw),
        in_specs=[x_spec, w_spec],
        out_specs=pl.BlockSpec((Cout, 2), lambda n, h: (0, 0)),
        compiler_params=pltpu.CompilerParams(
            dimension_semantics=("arbitrary", "arbitrary"),
            vmem_limit_bytes=vmem_limit),
    )(xr, wt)

    # Tiny (Cout,)-sized glue: fold BN into the weight (scale) + a shift.
    m_total = float(N * HW)
    mean = stats[:, 0] / m_total
    var = stats[:, 1] / m_total - mean * mean        # biased variance (training BN)
    inv_std = jax.lax.rsqrt(var + BN_EPS)
    scale = gamma * inv_std                          # (Cout,)
    ws = wt * scale[:, None]                         # scale folded into conv weight
    shift = (beta - mean * scale).reshape(Cout, 1)

    # ---- Pass 2: normalize + ReLU + global average pool ---------------------
    kernel2 = functools.partial(_norm_pool_kernel, inv_hw=1.0 / HW)
    pooled = pl.pallas_call(
        kernel2,
        out_shape=jax.ShapeDtypeStruct((N, Cout, 1), jnp.float32),
        grid=(N, n_hw),
        in_specs=[x_spec, w_spec,
                  pl.BlockSpec((Cout, 1), lambda n, h: (0, 0))],
        out_specs=pl.BlockSpec((1, Cout, 1), lambda n, h: (n, 0, 0)),
        compiler_params=pltpu.CompilerParams(
            dimension_semantics=("parallel", "arbitrary"),
            vmem_limit_bytes=vmem_limit),
    )(xr, ws, shift)

    return pooled.reshape(N, Cout, 1, 1)


def init_params(key, in_channels, out_channels):
    """Deterministic synthetic params matching nn.Conv2d(.,.,1) + BatchNorm2d."""
    k1, k2, k3, k4 = jax.random.split(key, 4)
    return {
        "w": jax.random.normal(k1, (out_channels, in_channels), jnp.float32) * 0.1,
        "b": jax.random.normal(k2, (out_channels,), jnp.float32) * 0.1,   # cancelled by BN; kept for fidelity
        "gamma": 1.0 + 0.1 * jax.random.normal(k3, (out_channels,), jnp.float32),
        "beta": 0.1 * jax.random.normal(k4, (out_channels,), jnp.float32),
    }


def _reference(x, params):
    """Pure-JAX reference (includes the conv bias, training-mode BN, ReLU, pool)."""
    w, b = params["w"], params["b"]
    y = jnp.einsum("nchw,oc->nohw", x, w) + b[None, :, None, None]
    mean = jnp.mean(y, axis=(0, 2, 3), keepdims=True)
    var = jnp.mean((y - mean) ** 2, axis=(0, 2, 3), keepdims=True)
    y = (y - mean) * jax.lax.rsqrt(var + BN_EPS)
    y = y * params["gamma"][None, :, None, None] + params["beta"][None, :, None, None]
    y = jnp.maximum(y, 0.0)
    return jnp.mean(y, axis=(2, 3), keepdims=True)   # AdaptiveAvgPool2d(1)


if __name__ == "__main__":
    key = jax.random.PRNGKey(0)
    k_x, k_p = jax.random.split(key)

    N, Cin, H, W = 2, 4, 16, 16
    Cout = 16

    x = jax.random.normal(k_x, (N, Cin, H, W), jnp.float32)
    params = init_params(k_p, Cin, Cout)

    # 128-lane tiles -> exercises the multi-tile accumulation path.
    out = global_block(x, params, block_hw=128)
    out = jax.block_until_ready(out)

    ref = _reference(x, params)
    assert out.shape == (N, Cout, 1, 1)
    assert jnp.allclose(out, ref, atol=1e-4, rtol=1e-4), "mismatch vs reference"

    # Also exercise the default (single full-extent tile) path.
    out2 = jax.block_until_ready(global_block(x, params))
    assert jnp.allclose(out2, ref, atol=1e-4, rtol=1e-4), "mismatch vs reference (default tile)"

    print("KERNEL_OK")
</pallas_src>

<mosaic_0001>
module attributes {stable_mosaic.version = 11 : i64} {
  func.func @_stats_kernel(%arg0: i32, %arg1: i32, %arg2: memref<1x4x128xf32, #tpu.memory_space<vmem>>, %arg3: memref<16x4xf32, #tpu.memory_space<vmem>>, %arg4: memref<16x2xf32, #tpu.memory_space<vmem>>) attributes {dimension_semantics = [#tpu.dimension_semantics<arbitrary>, #tpu.dimension_semantics<arbitrary>], iteration_bounds = array<i64: 2, 2>, scalar_prefetch = 0 : i64, scratch_operands = 0 : i64, tpu.core_type = #tpu.core_type<tc>, window_params = [{transform_indices = @transform_0, window_bounds = array<i64: 1, 4, 128>}, {pipeline_mode = #tpu.pipeline_mode<synchronous>, transform_indices = @transform_1, window_bounds = array<i64: 16, 4>}, {pipeline_mode = #tpu.pipeline_mode<synchronous>, transform_indices = @transform_2, window_bounds = array<i64: 16, 2>}]} {
    %c0_i32 = arith.constant 0 : i32
    %0 = arith.cmpi eq, %arg0, %c0_i32 : i32
    %c0_i32_0 = arith.constant 0 : i32
    %1 = arith.cmpi eq, %arg1, %c0_i32_0 : i32
    %2 = arith.andi %0, %1 : i1
    %3 = arith.extui %2 : i1 to i32
    %c0_i32_1 = arith.constant 0 : i32
    %4 = arith.cmpi ne, %3, %c0_i32_1 : i32
    scf.if %4 {
      %cst_15 = arith.constant 0.000000e+00 : f32
      %20 = vector.broadcast %cst_15 : f32 to vector<16x2xf32>
      %c0_16 = arith.constant 0 : index
      %c0_17 = arith.constant 0 : index
      %21 = vector.load %arg4[%c0_16, %c0_17] : memref<16x2xf32, #tpu.memory_space<vmem>>, vector<16x2xf32>
      tpu.vector_store %arg4[%c0_16, %c0_17], %20 {strides = array<i32>} : memref<16x2xf32, #tpu.memory_space<vmem>>, vector<16x2xf32>,
    } else {
    }
    %c0 = arith.constant 0 : index
    %c0_2 = arith.constant 0 : index
    %5 = vector.load %arg3[%c0, %c0_2] : memref<16x4xf32, #tpu.memory_space<vmem>>, vector<16x4xf32>
    %c0_3 = arith.constant 0 : index
    %c0_4 = arith.constant 0 : index
    %c0_5 = arith.constant 0 : index
    %6 = vector.load %arg2[%c0_3, %c0_4, %c0_5] : memref<1x4x128xf32, #tpu.memory_space<vmem>>, vector<1x4x128xf32>
    %7 = vector.shape_cast %6 : vector<1x4x128xf32> to vector<4x128xf32>
    %cst = arith.constant dense<0.000000e+00> : vector<16x128xf32>
    %8 = tpu.matmul %5, %7, %cst {dimension_numbers = #tpu.dot_dimension_numbers<[1], [0], [0], [1], [0, 0, 1, 1], [], []>} : vector<16x4xf32>, vector<4x128xf32>, vector<16x128xf32> -> vector<16x128xf32>
    %c0_6 = arith.constant 0 : index
    %c0_7 = arith.constant 0 : index
    %9 = vector.load %arg4[%c0_6, %c0_7] : memref<16x2xf32, #tpu.memory_space<vmem>>, vector<16x1xf32>
    %cst_8 = arith.constant dense<0.000000e+00> : vector<16xf32>
    %10 = vector.multi_reduction <add>, %8, %cst_8 [1] : vector<16x128xf32> to vector<16xf32>
    %11 = vector.shape_cast %10 : vector<16xf32> to vector<16x1xf32>
    %12 = arith.addf %9, %11 : vector<16x1xf32>
    %c0_9 = arith.constant 0 : index
    %c0_10 = arith.constant 0 : index
    %13 = vector.load %arg4[%c0_9, %c0_10] : memref<16x2xf32, #tpu.memory_space<vmem>>, vector<16x1xf32>
    tpu.vector_store %arg4[%c0_9, %c0_10], %12 {strides = array<i32>} : memref<16x2xf32, #tpu.memory_space<vmem>>, vector<16x1xf32>,
    %c0_11 = arith.constant 0 : index
    %c1 = arith.constant 1 : index
    %14 = vector.load %arg4[%c0_11, %c1] : memref<16x2xf32, #tpu.memory_space<vmem>>, vector<16x1xf32>
    %15 = arith.mulf %8, %8 : vector<16x128xf32>
    %cst_12 = arith.constant dense<0.000000e+00> : vector<16xf32>
    %16 = vector.multi_reduction <add>, %15, %cst_12 [1] : vector<16x128xf32> to vector<16xf32>
    %17 = vector.shape_cast %16 : vector<16xf32> to vector<16x1xf32>
    %18 = arith.addf %14, %17 : vector<16x1xf32>
    %c0_13 = arith.constant 0 : index
    %c1_14 = arith.constant 1 : index
    %19 = vector.load %arg4[%c0_13, %c1_14] : memref<16x2xf32, #tpu.memory_space<vmem>>, vector<16x1xf32>
    tpu.vector_store %arg4[%c0_13, %c1_14], %18 {strides = array<i32>} : memref<16x2xf32, #tpu.memory_space<vmem>>, vector<16x1xf32>,
    return
  }
  func.func @transform_0(%arg0: i32, %arg1: i32) -> (i32, i32, i32) {
    %c0_i32 = arith.constant 0 : i32
    %c0_i32_0 = arith.constant 0 : i32
    return %arg0, %c0_i32, %arg1 : i32, i32, i32
  }
  func.func @transform_1(%arg0: i32, %arg1: i32) -> (i32, i32) {
    %c0_i32 = arith.constant 0 : i32
    %c0_i32_0 = arith.constant 0 : i32
    %c0_i32_1 = arith.constant 0 : i32
    return %c0_i32, %c0_i32_0 : i32, i32
  }
  func.func @transform_2(%arg0: i32, %arg1: i32) -> (i32, i32) {
    %c0_i32 = arith.constant 0 : i32
    %c0_i32_0 = arith.constant 0 : i32
    %c0_i32_1 = arith.constant 0 : i32
    return %c0_i32, %c0_i32_0 : i32, i32
  }
}

</mosaic_0001>

<bundles_post_ra>
// kernel: tpu_custom_call.1
= control target key start
LH: loop header
LB: loop body
LE: loop exit
PB: predicated region body
PF: predicated region fallthrough
CT: control target
= control target key end

     0   :  { %s435_s9 = smov 0   ;;  %s437_s10 = smov 0   ;;  %s519_s0 = inlined_call_operand.vmem [shape: f32[2,4,256], index: 0, kind: input, shape index: {}]   ;;  %s520_s1 = inlined_call_operand.vmem [shape: f32[16,4], index: 1, kind: input, shape index: {}]   ;;  %s521_s2 = inlined_call_operand.vmem [shape: f32[16,2], index: 2, kind: output, shape index: {}]  }
   0x1   :  { %s439_s11 = smov 0   ;;  %s441_s12 = smov 0  }
   0x2   :  { %s443_s13 = smov 0  }
   0x3 LB: > { %s21_s14 = sadd.s32 1, %s409_s11  ;;  %s24_s15 = sadd.s32 1, %s413_s12  ;;  %s417_s13 = sphi %s443_s13, %s12_s13   ;;  %s413_s12 = sphi %s441_s12, %s525_s12   ;;  %s409_s11 = sphi %s439_s11, %s524_s11   ;;  %s405_s10 = sphi %s437_s10, %s523_s10   ;;  %s401_s9 = sphi %s435_s9, %s522_s9  }
   0x4   : > { %p22_p0 = scmp.ge.s32.totalorder %s21_s14, 2  ;;  %p322_p1 = scmp.ge.s32.totalorder %s417_s13, 1 }
   0x5   : > { %p124_p2 = scmp.lt.s32.totalorder %s417_s13, 5 }
   0x6   : > { %s527_s14 = smov (%p22_p0, %s21_s14), 0  ;;  %s529_s15 = smov (!%p22_p0, %s24_s15), %s413_s12 }
   0x7   : > { %p125_p3 = pnand %p322_p1, %p124_p2  ;;  %p26_p4 = scmp.ge.s32.totalorder %s529_s15, 2 }
   0x8   : > { %p144_p5 = scmp.lt.s32.totalorder (!%p125_p3), %s405_s10, 1  ;;  %p146_p6 = scmp.lt.s32.totalorder (!%p125_p3), %s401_s9, 1 }
   0x9   : > { %s531_s15 = smov (%p26_p4, %s529_s15), 0  ;;  %128 = sbr.rel (%p125_p3) target bundleno = 399 (0x18f), region = 28 }
   0xa   : > { %p152_p7 = scmp.eq.s32.totalorder (!%p125_p3), %s405_s10, 0  ;;  %p153_p8 = scmp.eq.s32.totalorder (!%p125_p3), %s401_s9, 0 }
   0xc   : > { %p154_p9 = pnand (!%p125_p3), %p153_p8, %p152_p7 }
  0x10   : > { %s533_s10 = smov (!%p144_p5, %s405_s10), 1  ;;  %s535_s9 = smov (!%p146_p6, %s401_s9), 1 }
  0x11   : > { %s323_s16 = sshll.u32 %s533_s10, 1  ;;  %157 = sbr.rel (%p154_p9) target bundleno = 24 (0x18), region = 32  ;;  %vm158_vm0 = vcmask (!%p154_p9), 15360   ;;  %v419_v0 = vmov (!%p154_p9), 0.0  }
  0x12   : > { %s149_s17 = sadd.s32 %s323_s16, %s535_s9  ;;  %159 = vst.msk [vmem:[%s521_s2] sm:$0xff] (!%p154_p9), %vm158_vm0, %v419_v0  ;;  %160 = vst.msk [vmem:[%s521_s2 + $0x8] sm:$0xff] (!%p154_p9), %vm158_vm0, %v419_v0 }
  0x13   : > { %s324_s18 = sshll.u32 %s149_s17, 2 }
  0x14   : > { %s151_s21 = scalar_lea.vmem %s519_s0, %s324_s18 }
  0x18 PF: > { %v163_v1 = vld [vmem:[%s151_s21] sm:$0xf]  ;;  %vm171_vm1 = vcmask 1043456   ;;  %vm164_vm2 = vcmask 31744   ;;  %v162_v3 = vld [vmem:[%s520_s1 + $0x8] sm:$0xff]  ;;  %vm258_vm3 = vcmask 7168  }
  0x19   : > { %v161_v2 = vld [vmem:[%s520_s1] sm:$0xff]  ;;  %333 = vmatprep.subr.msk.mxu0 %vm171_vm1, %v163_v1  ;;  %v251_v11 = vld [vmem:[%s521_s2 + $0x8] sm:$0xff]  ;;  %vm271_vm4 = vcmask 15368  }
  0x1a   : > { %335 = vmatprep.mubr.msk.f32.mxu0 %vm164_vm2, %v161_v2  ;;  %334 = vmatpush3.msk.msra.mxu0 %vm171_vm1, %v163_v1  ;;  %v250_v8 = vld [vmem:[%s521_s2] sm:$0xff] }
  0x1b   : > { %336 = vmatmul.mubr.msk.f32.vlgmr.msra.gmra.mrb[0].mxu0 %vm164_vm2, %v162_v3 }
  0xee   : > { %v337_v4 = vpop.f32.mrb[0].mxu0 }
  0xef   : > { %v241_v5 = vpop.f32.mrb[1].mxu0  ;;  %v264_v7 = vmul.f32 %v337_v4, %v337_v4 }
  0xf0   : > { %252 = vadd.xlane.f32.xlu0 %v241_v5  ;;  %v263_v6 = vmul.f32 %v241_v5, %v241_v5 }
  0xf2   : > { %265 = vadd.xlane.f32.xlu1 %v263_v6 }
  0xf4   : > { %254 = vadd.xlane.f32.xlu0 %v337_v4 }
  0xf6   : > { %267 = vadd.xlane.f32.xlu1 %v264_v7 }
 0x17d   : > { %v253_v9 = vpop.xlane.xlu0 %252 }
 0x17e   : > { %v256_v10 = vadd.f32 %v253_v9, %v250_v8 }
 0x17f   : > { %v266_v14 = vpop.xlane.xlu1 %265 }
 0x180   : > { %259 = vst.msk [vmem:[%s521_s2] sm:$0xff] %vm258_vm3, %v256_v10 }
 0x181   : > { %v255_v12 = vpop.xlane.xlu0 %254 }
 0x182   : > { %v257_v13 = vadd.f32 %v255_v12, %v251_v11 }
 0x183   : > { %v268_v18 = vpop.xlane.xlu1 %267 }
 0x184   : > { %260 = vst.msk [vmem:[%s521_s2 + $0x8] sm:$0xff] %vm258_vm3, %v257_v13 }
 0x187   : > { %v261_v15 = vld [vmem:[%s521_s2] sm:$0xff] }
 0x188   : > { %v269_v16 = vadd.f32 %v266_v14, %v261_v15 }
 0x18a   : > { %272 = vst.msk [vmem:[%s521_s2] sm:$0xff] %vm271_vm4, %v269_v16 }
 0x18b   : > { %v262_v17 = vld [vmem:[%s521_s2 + $0x8] sm:$0xff] }
 0x18c   : > { %v270_v19 = vadd.f32 %v268_v18, %v262_v17 }
 0x18e   : > { %273 = vst.msk [vmem:[%s521_s2 + $0x8] sm:$0xff] %vm271_vm4, %v270_v19 }
 0x18f PF: > { %s12_s13 = sadd.s32 1, %s417_s13   ;;  %s522_s9 = smov %s409_s11 }
 0x190   : > { %p9_p10 = scmp.ge.s32.totalorder %s12_s13, 6   ;;  %s523_s10 = smov %s413_s12 }
 0x191   : > { %s524_s11 = smov %s527_s14  ;;  %s525_s12 = smov %s531_s15 }
 0x192   :  { %11 = sbr.rel (!%p9_p10) target bundleno = 3 (0x3), region = 58 }

</bundles_post_ra>
